<compile_context>
chip_gen: v6e
topology: v6e:2x2x1
jax: 0.10.0
libtpu: 0.0.40
codegen_flags: <defaults>
</compile_context>

<pallas_src>
import functools

import jax
import jax.numpy as jnp
from jax import lax
from jax.experimental import pallas as pl
from jax.experimental.pallas import tpu as pltpu


def _round_up(x, m):
    return (x + m - 1) // m * m


def _vmem_limit(nbytes):
    # Actual buffer footprint + 50% headroom for compiler-internal scratch.
    # Re-derive tile sizes per generation: v5e/v6e have 128 MiB physical VMEM,
    # v7x only 64 MiB per TensorCore.
    return int(min(max(nbytes * 3 // 2, 16 << 20), 128 << 20))


# ---------------------------------------------------------------------------
# Phase 1: fused K/V projection    [K | V] = x @ [Wk^T | Wv^T] + [bk | bv]
# (Q is fused into the attention kernel and never written to HBM.)
# ---------------------------------------------------------------------------
def _kv_proj_kernel(x_ref, w_ref, b_ref, k_ref, v_ref, *, hp):
    y = jnp.dot(x_ref[...], w_ref[...], preferred_element_type=jnp.float32)
    y = y + b_ref[...]                               # bias kept in f32
    k_ref[...] = y[:, :hp].astype(k_ref.dtype)
    v_ref[...] = y[:, hp:].astype(v_ref.dtype)


# ---------------------------------------------------------------------------
# Phase 2: fused Q projection + flash attention (online softmax over kv tiles)
# ---------------------------------------------------------------------------
def _attn_kernel(*refs, needs_mask):
    if needs_mask:
        (x_ref, wq_ref, bq_ref, k_ref, v_ref, mask_ref,
         o_ref, q_sc, m_sc, l_sc, acc_sc) = refs
    else:
        (x_ref, wq_ref, bq_ref, k_ref, v_ref,
         o_ref, q_sc, m_sc, l_sc, acc_sc) = refs
        mask_ref = None

    kv = pl.program_id(1)

    @pl.when(kv == 0)
    def _():
        # Fused Q projection: computed once per q tile, kept in VMEM scratch.
        q = jnp.dot(x_ref[...], wq_ref[...], preferred_element_type=jnp.float32)
        q_sc[...] = (q + bq_ref[...]).astype(q_sc.dtype)
        m_sc[...] = jnp.full_like(m_sc, -1e30)
        l_sc[...] = jnp.zeros_like(l_sc)
        acc_sc[...] = jnp.zeros_like(acc_sc)

    # scores = Q @ K^T : contract the last dims directly (no in-kernel .T).
    s = lax.dot_general(
        q_sc[...], k_ref[...],
        dimension_numbers=(((1,), (1,)), ((), ())),
        preferred_element_type=jnp.float32)                       # (tq, tk)

    if needs_mask:
        # Static branch: only emitted when S is not tile-aligned.  Additive
        # -1e30 on trailing padded keys; padding is trailing so the first kv
        # tile always contains real keys that seed the running max m.
        s = s + mask_ref[...]

    m_prev = m_sc[...]
    m_new = jnp.maximum(m_prev, jnp.max(s, axis=1, keepdims=True))
    alpha = jnp.exp(m_prev - m_new)
    p = jnp.exp(s - m_new)

    l_sc[...] = alpha * l_sc[...] + jnp.sum(p, axis=1, keepdims=True)
    acc_sc[...] = alpha * acc_sc[...] + jnp.dot(
        p.astype(v_ref.dtype), v_ref[...], preferred_element_type=jnp.float32)
    m_sc[...] = m_new

    @pl.when(kv == pl.num_programs(1) - 1)
    def _():
        # Exact reciprocal: it acts on a (tq, 1) vector, so approx buys nothing.
        inv_l = pl.reciprocal(l_sc[...], approx=False)
        o_ref[...] = (acc_sc[...] * inv_l).astype(o_ref.dtype)


# ---------------------------------------------------------------------------
# Parameter packing (hoisted: run once, reuse across calls)
# ---------------------------------------------------------------------------
def pack_params(wq, wk, wv, bq, bk, bv, *, compute_dtype=None):
    """Pre-transpose / pad / pack nn.Linear weights into lane-dense blocks."""
    H = wq.shape[0]
    Hp = _round_up(H, 128)
    cdt = jnp.dtype(compute_dtype) if compute_dtype is not None else wq.dtype

    def pad_wt(w):                                    # y = x @ w.T -> pass w.T
        return jnp.zeros((Hp, Hp), cdt).at[:H, :H].set(w.T.astype(cdt))

    def pad_b(b):                                     # biases stay in f32
        return jnp.zeros((Hp,), jnp.float32).at[:H].set(b.astype(jnp.float32))

    return dict(
        hidden=H, hp=Hp, cdt=cdt,
        wq_t=pad_wt(wq),
        w_kv=jnp.concatenate([pad_wt(wk), pad_wt(wv)], axis=1),
        bq=pad_b(bq).reshape(1, Hp),
        b_kv=jnp.concatenate([pad_b(bk), pad_b(bv)]).reshape(1, 2 * Hp),
    )


# ---------------------------------------------------------------------------
# Wrapper
# ---------------------------------------------------------------------------
def self_attention(x, params, *, tq=512, tk=256):
    """x: (S, H); params from pack_params.  Returns (S, H) in x.dtype."""
    S, H = x.shape
    assert H == params["hidden"]
    Hp, cdt = params["hp"], params["cdt"]
    dtype = x.dtype
    isz = jnp.dtype(cdt).itemsize
    xsz = jnp.dtype(dtype).itemsize

    assert tq % tk == 0, "tq must be a multiple of tk"
    Sp = _round_up(max(S, 1), tq)                 # tile-aligned sequence
    tq = min(tq, Sp)
    tk = min(tk, Sp)

    x_p = jnp.zeros((Sp, Hp), dtype).at[:S, :H].set(x)

    # --- Phase 1: K/V projection (weights resident, row tiles pipelined) ----
    vmem1 = _vmem_limit(
        2 * tq * Hp * xsz              # x row tiles (double-buffered)
        + Hp * 2 * Hp * isz            # packed W_kv (single resident copy)
        + 2 * Hp * 4                   # packed bias (f32)
        + 2 * 2 * tq * Hp * isz)       # K, V output tiles (double-buffered)

    k, v = pl.pallas_call(
        functools.partial(_kv_proj_kernel, hp=Hp),
        out_shape=(jax.ShapeDtypeStruct((Sp, Hp), cdt),
                   jax.ShapeDtypeStruct((Sp, Hp), cdt)),
        grid=(Sp // tq,),
        in_specs=[
            pl.BlockSpec((tq, Hp), lambda i: (i, 0)),           # x row tile
            # Grid-invariant weight/bias: whole-array VMEM residency — one
            # buffer, no double-buffering (v7x 64 MiB VMEM concern).
            pl.BlockSpec(memory_space=pltpu.MemorySpace.VMEM),  # packed W_kv
            pl.BlockSpec(memory_space=pltpu.MemorySpace.VMEM),  # packed bias
        ],
        out_specs=(pl.BlockSpec((tq, Hp), lambda i: (i, 0)),
                   pl.BlockSpec((tq, Hp), lambda i: (i, 0))),
        compiler_params=pltpu.CompilerParams(
            dimension_semantics=("parallel",),
            vmem_limit_bytes=vmem1),
    )(x_p, params["w_kv"], params["b_kv"])

    # --- Phase 2: fused Q projection + flash attention -----------------------
    needs_mask = S < Sp        # static: skip masking when already tile-aligned

    in_specs = [
        pl.BlockSpec((tq, Hp), lambda i, j: (i, 0)),            # x tile (for Q)
        pl.BlockSpec(memory_space=pltpu.MemorySpace.VMEM),      # Wq^T resident
        pl.BlockSpec(memory_space=pltpu.MemorySpace.VMEM),      # bq resident
        pl.BlockSpec((tk, Hp), lambda i, j: (j, 0)),            # K tile
        pl.BlockSpec((tk, Hp), lambda i, j: (j, 0)),            # V tile
    ]
    args = [x_p, params["wq_t"], params["bq"], k, v]

    vmem2 = (2 * tq * Hp * xsz                # x row tiles
             + Hp * Hp * isz + Hp * 4         # Wq^T + bq (resident)
             + 2 * 2 * tk * Hp * isz          # K, V tiles (double-buffered)
             + 2 * tq * Hp * xsz              # output tiles
             + tq * Hp * isz                  # fused-Q scratch
             + 2 * tq * 4                     # m, l scratch
             + tq * Hp * 4)                   # f32 accumulator
    if needs_mask:
        mask = jnp.where(jnp.arange(Sp) < S, 0.0, -1e30).astype(jnp.float32)
        in_specs.append(pl.BlockSpec((1, tk), lambda i, j: (0, j)))
        args.append(mask.reshape(1, Sp))
        vmem2 += 2 * tk * 4

    out = pl.pallas_call(
        functools.partial(_attn_kernel, needs_mask=needs_mask),
        out_shape=jax.ShapeDtypeStruct((Sp, Hp), dtype),
        grid=(Sp // tq, Sp // tk),
        in_specs=in_specs,
        out_specs=pl.BlockSpec((tq, Hp), lambda i, j: (i, 0)),
        scratch_shapes=[
            pltpu.VMEM((tq, Hp), cdt),           # fused-Q tile
            pltpu.VMEM((tq, 1), jnp.float32),    # running max m
            pltpu.VMEM((tq, 1), jnp.float32),    # running sum l
            pltpu.VMEM((tq, Hp), jnp.float32),   # output accumulator
        ],
        compiler_params=pltpu.CompilerParams(
            dimension_semantics=("parallel", "arbitrary"),
            vmem_limit_bytes=_vmem_limit(vmem2)),
    )(*args)

    return out[:S, :H]


def _reference(x, wq, wk, wv, bq, bk, bv):
    q = x @ wq.T + bq
    k = x @ wk.T + bk
    v = x @ wv.T + bv
    s = q @ k.T
    w = jax.nn.softmax(s, axis=1)
    return w @ v


if __name__ == "__main__":
    seq, hidden = 8, 32

    key = jax.random.PRNGKey(0)
    kx, kq, kk, kv, kbq, kbk, kbv = jax.random.split(key, 7)

    bound = 1.0 / jnp.sqrt(hidden)
    x = jax.random.normal(kx, (seq, hidden), dtype=jnp.float32)
    wq = jax.random.uniform(kq, (hidden, hidden), minval=-bound, maxval=bound, dtype=jnp.float32)
    wk = jax.random.uniform(kk, (hidden, hidden), minval=-bound, maxval=bound, dtype=jnp.float32)
    wv = jax.random.uniform(kv, (hidden, hidden), minval=-bound, maxval=bound, dtype=jnp.float32)
    bq = jax.random.uniform(kbq, (hidden,), minval=-bound, maxval=bound, dtype=jnp.float32)
    bk = jax.random.uniform(kbk, (hidden,), minval=-bound, maxval=bound, dtype=jnp.float32)
    bv = jax.random.uniform(kbv, (hidden,), minval=-bound, maxval=bound, dtype=jnp.float32)

    # Pack once (hoisted out of the steady-state call path).
    # TODO(synk): pass compute_dtype=jnp.bfloat16 on v6e/v7x to halve the K/V
    # HBM stream; accumulation stays f32 so accuracy loss is small.
    params = pack_params(wq, wk, wv, bq, bk, bv)

    out = self_attention(x, params)
    out = jax.block_until_ready(out)

    ref = _reference(x, wq, wk, wv, bq, bk, bv)
    assert out.shape == (seq, hidden)
    # Note: no 1/sqrt(H) score scale, matching the reference PyTorch module.
    assert jnp.allclose(out, ref, atol=2e-3, rtol=2e-3), "mismatch vs reference"

    print("KERNEL_OK")
</pallas_src>

<mosaic_0001>
module attributes {stable_mosaic.version = 11 : i64} {
  func.func @_kv_proj_kernel(%arg0: i32, %arg1: memref<512x128xf32, #tpu.memory_space<vmem>>, %arg2: memref<128x256xf32, #tpu.memory_space<vmem>>, %arg3: memref<1x256xf32, #tpu.memory_space<vmem>>, %arg4: memref<512x128xf32, #tpu.memory_space<vmem>>, %arg5: memref<512x128xf32, #tpu.memory_space<vmem>>) attributes {dimension_semantics = [#tpu.dimension_semantics<parallel>], iteration_bounds = array<i64: 1>, scalar_prefetch = 0 : i64, scratch_operands = 0 : i64, tpu.core_type = #tpu.core_type<tc>, window_params = [{transform_indices = @transform_0, window_bounds = array<i64: 512, 128>}, {pipeline_mode = #tpu.pipeline_mode<synchronous>, transform_indices = @transform_1, window_bounds = array<i64: 128, 256>}, {pipeline_mode = #tpu.pipeline_mode<synchronous>, transform_indices = @transform_2, window_bounds = array<i64: 1, 256>}, {transform_indices = @transform_3, window_bounds = array<i64: 512, 128>}, {transform_indices = @transform_4, window_bounds = array<i64: 512, 128>}]} {
    %c0 = arith.constant 0 : index
    %c0_0 = arith.constant 0 : index
    %0 = vector.load %arg1[%c0, %c0_0] : memref<512x128xf32, #tpu.memory_space<vmem>>, vector<512x128xf32>
    %c0_1 = arith.constant 0 : index
    %c0_2 = arith.constant 0 : index
    %1 = vector.load %arg2[%c0_1, %c0_2] : memref<128x256xf32, #tpu.memory_space<vmem>>, vector<128x256xf32>
    %cst = arith.constant dense<0.000000e+00> : vector<512x256xf32>
    %2 = tpu.matmul %0, %1, %cst {dimension_numbers = #tpu.dot_dimension_numbers<[1], [0], [0], [1], [0, 0, 1, 1], [], []>} : vector<512x128xf32>, vector<128x256xf32>, vector<512x256xf32> -> vector<512x256xf32>
    %c0_3 = arith.constant 0 : index
    %c0_4 = arith.constant 0 : index
    %3 = vector.load %arg3[%c0_3, %c0_4] : memref<1x256xf32, #tpu.memory_space<vmem>>, vector<1x256xf32>
    %4 = vector.broadcast %3 : vector<1x256xf32> to vector<512x256xf32>
    %5 = arith.addf %2, %4 : vector<512x256xf32>
    %6 = vector.extract_strided_slice %5 {offsets = [0, 0], sizes = [512, 128], strides = [1, 1]} : vector<512x256xf32> to vector<512x128xf32>
    %c0_5 = arith.constant 0 : index
    %c0_6 = arith.constant 0 : index
    %7 = vector.load %arg4[%c0_5, %c0_6] : memref<512x128xf32, #tpu.memory_space<vmem>>, vector<512x128xf32>
    tpu.vector_store %arg4[%c0_5, %c0_6], %6 {strides = array<i32>} : memref<512x128xf32, #tpu.memory_space<vmem>>, vector<512x128xf32>,
    %8 = vector.extract_strided_slice %5 {offsets = [0, 128], sizes = [512, 128], strides = [1, 1]} : vector<512x256xf32> to vector<512x128xf32>
    %c0_7 = arith.constant 0 : index
    %c0_8 = arith.constant 0 : index
    %9 = vector.load %arg5[%c0_7, %c0_8] : memref<512x128xf32, #tpu.memory_space<vmem>>, vector<512x128xf32>
    tpu.vector_store %arg5[%c0_7, %c0_8], %8 {strides = array<i32>} : memref<512x128xf32, #tpu.memory_space<vmem>>, vector<512x128xf32>,
    return
  }
  func.func @transform_0(%arg0: i32) -> (i32, i32) {
    %c0_i32 = arith.constant 0 : i32
    %c0_i32_0 = arith.constant 0 : i32
    return %arg0, %c0_i32 : i32, i32
  }
  func.func @transform_1(%arg0: i32) -> (i32, i32) {
    %c0_i32 = arith.constant 0 : i32
    %c0_i32_0 = arith.constant 0 : i32
    %c0_i32_1 = arith.constant 0 : i32
    return %c0_i32, %c0_i32_0 : i32, i32
  }
  func.func @transform_2(%arg0: i32) -> (i32, i32) {
    %c0_i32 = arith.constant 0 : i32
    %c0_i32_0 = arith.constant 0 : i32
    %c0_i32_1 = arith.constant 0 : i32
    return %c0_i32, %c0_i32_0 : i32, i32
  }
  func.func @transform_3(%arg0: i32) -> (i32, i32) {
    %c0_i32 = arith.constant 0 : i32
    %c0_i32_0 = arith.constant 0 : i32
    return %arg0, %c0_i32 : i32, i32
  }
  func.func @transform_4(%arg0: i32) -> (i32, i32) {
    %c0_i32 = arith.constant 0 : i32
    %c0_i32_0 = arith.constant 0 : i32
    return %arg0, %c0_i32 : i32, i32
  }
}

</mosaic_0001>

<bundles_post_ra>
// kernel: tpu_custom_call.1
= control target key start
LH: loop header
LB: loop body
LE: loop exit
PB: predicated region body
PF: predicated region fallthrough
CT: control target
= control target key end

     0   :  { %10 = vsyncpa [#allocation3], 0  ;;  %s1148_s0 = inlined_call_operand.hbm [shape: f32[512,128], index: 0, kind: input, shape index: {}]   ;;  %s1149_s1 = inlined_call_operand.hbm [shape: f32[128,256], index: 1, kind: input, shape index: {}]   ;;  %s1150_s2 = inlined_call_operand.vmem [shape: f32[1,256], index: 2, kind: input, shape index: {}]   ;;  %s1151_s3 = inlined_call_operand.hbm [shape: f32[512,128], index: 3, kind: output, shape index: {0}]   ;;  %s1152_s4 = inlined_call_operand.hbm [shape: f32[512,128], index: 4, kind: output, shape index: {1}]  }
   0x1   :  { %11 = vsyncpa [#allocation6], 0 }
   0x2   :  { %12 = vsyncpa [#allocation4], 0 }
   0x3   :  { %13 = vsyncpa [#allocation9], 0  ;;  %s894_s15 = smov [#allocation2]  }
   0x4   :  { %s19_s16 = sshll.u32 %s894_s15, 4  ;;  %s20_s16 = int_to_ptr.vmem [resolvable:$true] %s19_s16 }
   0x5   :  { %s814_s17 = scalar_lea.vmem %s20_s16, 8192  ;;  %p819_p1 = scmp.lt.s32.totalorder %s20_s16, %s20_s16 }
   0x6   :  { %p815_p0 = scmp.ne.s32.totalorder %s20_s16, %s814_s17  ;;  %p820_p2 = scmp.lt.s32.totalorder %s814_s17, %s814_s17 }
   0x8   :  { %p821_p3 = por %p820_p2, %p819_p1 }
   0xa   :  { %p822_p4 = pnand %p821_p3, %p815_p0 }
   0xc   :  { %825 = shalt.err (!%p822_p4)
}
   0xd   :  { %s895_s18 = smov 128   ;;  %s896_s19 = smov 8  }
   0xe   :  { %25 = dma.hbm_to_vmem [thread:$0]  %s1148_s0, 8192, %s20_s16, [#allocation3], %s895_s18, %s895_s18, %s896_s19  }
   0xf   :  { %s897_s22 = smov [#allocation5]  }
  0x10   :  { %s31_s23 = sshll.u32 %s897_s22, 4  ;;  %s32_s23 = int_to_ptr.vmem [resolvable:$true] %s31_s23 }
  0x11   :  { %s834_s24 = scalar_lea.vmem %s32_s23, 4096  ;;  %p839_p6 = scmp.lt.s32.totalorder %s32_s23, %s32_s23 }
  0x12   :  { %p835_p5 = scmp.ne.s32.totalorder %s32_s23, %s834_s24  ;;  %p840_p7 = scmp.lt.s32.totalorder %s834_s24, %s834_s24 }
  0x14   :  { %p841_p8 = por %p840_p7, %p839_p6 }
  0x16   :  { %p842_p9 = pnand %p841_p8, %p835_p5 }
  0x18   :  { %845 = shalt.err (!%p842_p9)
}
  0x19   :  { %s898_s25 = smov 256   ;;  %s899_s26 = smov 16  }
  0x1a   :  { %37 = dma.hbm_to_vmem [thread:$0]  %s1149_s1, 4096, %s32_s23, [#allocation6], %s898_s25, %s898_s25, %s899_s26  }
  0x1b   :  { %886 = dma.done.wait [#allocation3], 8192  }
  0x1c   :  { %887 = vsyncadd [#allocation3], 4294959104 }
  0x1d   :  { %888 = dma.done.wait [#allocation6], 4096  }
  0x1e   :  { %889 = vsyncadd [#allocation6], 4294963200  ;;  %v900_v0 = vmov 0.0   ;;  %v141_v1 = vld [vmem:[#allocation5 + $0xf8] sm:$0xff]  ;;  %v140_v2 = vld [vmem:[#allocation5 + $0xf0] sm:$0xff]  ;;  %s902_s30 = smov [#allocation8]  }
  0x1f   :  { %218 = vmatprep.mubr.f32.mxu0 %v900_v0  ;;  %410 = vmatprep.mubr.f32.mxu1 %v900_v0  ;;  %v139_v3 = vld [vmem:[#allocation5 + $0xe8] sm:$0xff]  ;;  %v138_v4 = vld [vmem:[#allocation5 + $0xe0] sm:$0xff]  ;;  %v137_v5 = vld [vmem:[#allocation5 + $0xd8] sm:$0xff]  ;;  %s748_s5 = sshll.u32 %s902_s30, 4  ;;  %s749_s5 = int_to_ptr.vmem [resolvable:$true] %s748_s5 }
  0x20   :  { %154 = vmatprep.subr.mxu0 %v141_v1  ;;  %765 = vmatprep.subr.mxu1 %v141_v1  ;;  %v136_v6 = vld [vmem:[#allocation5 + $0xd0] sm:$0xff]  ;;  %v135_v7 = vld [vmem:[#allocation5 + $0xc8] sm:$0xff]  ;;  %v134_v8 = vld [vmem:[#allocation5 + $0xc0] sm:$0xff] }
  0x21   :  { %155 = vmatpush1.msra.mxu0 %v140_v2  ;;  %781 = vmatpush1.msra.mxu1 %v140_v2  ;;  %v133_v9 = vld [vmem:[#allocation5 + $0xb8] sm:$0xff]  ;;  %v132_v10 = vld [vmem:[#allocation5 + $0xb0] sm:$0xff]  ;;  %v131_v11 = vld [vmem:[#allocation5 + $0xa8] sm:$0xff] }
  0x22   :  { %156 = vmatprep.subr.mxu0 %v139_v3  ;;  %766 = vmatprep.subr.mxu1 %v139_v3  ;;  %v130_v12 = vld [vmem:[#allocation5 + $0xa0] sm:$0xff]  ;;  %v129_v13 = vld [vmem:[#allocation5 + $0x98] sm:$0xff]  ;;  %v128_v14 = vld [vmem:[#allocation5 + $0x90] sm:$0xff] }
  0x23   :  { %157 = vmatpush1.msra.mxu0 %v138_v4  ;;  %782 = vmatpush1.msra.mxu1 %v138_v4  ;;  %v127_v15 = vld [vmem:[#allocation5 + $0x88] sm:$0xff]  ;;  %v126_v16 = vld [vmem:[#allocation5 + $0x80] sm:$0xff]  ;;  %v125_v17 = vld [vmem:[#allocation5 + $0x78] sm:$0xff] }
  0x24   :  { %158 = vmatprep.subr.mxu0 %v137_v5  ;;  %767 = vmatprep.subr.mxu1 %v137_v5  ;;  %v124_v18 = vld [vmem:[#allocation5 + $0x70] sm:$0xff]  ;;  %v123_v19 = vld [vmem:[#allocation5 + $0x68] sm:$0xff]  ;;  %v122_v20 = vld [vmem:[#allocation5 + $0x60] sm:$0xff] }
  0x25   :  { %159 = vmatpush1.msra.mxu0 %v136_v6  ;;  %783 = vmatpush1.msra.mxu1 %v136_v6  ;;  %v121_v21 = vld [vmem:[#allocation5 + $0x58] sm:$0xff]  ;;  %v120_v22 = vld [vmem:[#allocation5 + $0x50] sm:$0xff]  ;;  %v119_v23 = vld [vmem:[#allocation5 + $0x48] sm:$0xff] }
  0x26   :  { %160 = vmatprep.subr.mxu0 %v135_v7  ;;  %768 = vmatprep.subr.mxu1 %v135_v7  ;;  %v118_v24 = vld [vmem:[#allocation5 + $0x40] sm:$0xff]  ;;  %v117_v25 = vld [vmem:[#allocation5 + $0x38] sm:$0xff]  ;;  %v116_v26 = vld [vmem:[#allocation5 + $0x30] sm:$0xff] }
  0x27   :  { %161 = vmatpush1.msra.mxu0 %v134_v8  ;;  %784 = vmatpush1.msra.mxu1 %v134_v8  ;;  %v115_v27 = vld [vmem:[#allocation5 + $0x28] sm:$0xff]  ;;  %v114_v28 = vld [vmem:[#allocation5 + $0x20] sm:$0xff]  ;;  %v113_v29 = vld [vmem:[#allocation5 + $0x18] sm:$0xff] }
  0x28   :  { %162 = vmatprep.subr.mxu0 %v133_v9  ;;  %769 = vmatprep.subr.mxu1 %v133_v9  ;;  %v112_v30 = vld [vmem:[#allocation5 + $0x10] sm:$0xff]  ;;  %v111_v31 = vld [vmem:[#allocation5 + $0x8] sm:$0xff]  ;;  %v110_v32 = vld [vmem:[#allocation5] sm:$0xff] }
  0x29   :  { %163 = vmatpush1.msra.mxu0 %v132_v10  ;;  %785 = vmatpush1.msra.mxu1 %v132_v10  ;;  %v46_v33 = vld [vmem:[#allocation2] sm:$0xff]  ;;  %v47_v35 = vld [vmem:[#allocation2 + $0x8] sm:$0xff]  ;;  %v48_v37 = vld [vmem:[#allocation2 + $0x10] sm:$0xff] }
  0x2a   :  { %164 = vmatprep.subr.mxu0 %v131_v11  ;;  %770 = vmatprep.subr.mxu1 %v131_v11  ;;  %v78_v34 = vld [vmem:[#allocation2 + $0x100] sm:$0xff]  ;;  %v79_v36 = vld [vmem:[#allocation2 + $0x108] sm:$0xff]  ;;  %v80_v38 = vld [vmem:[#allocation2 + $0x110] sm:$0xff] }
  0x2b   :  { %165 = vmatpush1.msra.mxu0 %v130_v12  ;;  %786 = vmatpush1.msra.mxu1 %v130_v12  ;;  %v49_v39 = vld [vmem:[#allocation2 + $0x18] sm:$0xff]  ;;  %v50_v41 = vld [vmem:[#allocation2 + $0x20] sm:$0xff]  ;;  %v51_v43 = vld [vmem:[#allocation2 + $0x28] sm:$0xff] }
  0x2c   :  { %166 = vmatprep.subr.mxu0 %v129_v13  ;;  %771 = vmatprep.subr.mxu1 %v129_v13  ;;  %v81_v40 = vld [vmem:[#allocation2 + $0x118] sm:$0xff]  ;;  %v82_v42 = vld [vmem:[#allocation2 + $0x120] sm:$0xff]  ;;  %v83_v44 = vld [vmem:[#allocation2 + $0x128] sm:$0xff] }
  0x2d   :  { %167 = vmatpush1.msra.mxu0 %v128_v14  ;;  %787 = vmatpush1.msra.mxu1 %v128_v14  ;;  %v52_v45 = vld [vmem:[#allocation2 + $0x30] sm:$0xff]  ;;  %v53_v47 = vld [vmem:[#allocation2 + $0x38] sm:$0xff]  ;;  %v54_v49 = vld [vmem:[#allocation2 + $0x40] sm:$0xff] }
  0x2e   :  { %168 = vmatprep.subr.mxu0 %v127_v15  ;;  %772 = vmatprep.subr.mxu1 %v127_v15  ;;  %v84_v46 = vld [vmem:[#allocation2 + $0x130] sm:$0xff]  ;;  %v85_v48 = vld [vmem:[#allocation2 + $0x138] sm:$0xff]  ;;  %v86_v50 = vld [vmem:[#allocation2 + $0x140] sm:$0xff] }
  0x2f   :  { %169 = vmatpush1.msra.mxu0 %v126_v16  ;;  %788 = vmatpush1.msra.mxu1 %v126_v16  ;;  %v55_v51 = vld [vmem:[#allocation2 + $0x48] sm:$0xff]  ;;  %v56_v53 = vld [vmem:[#allocation2 + $0x50] sm:$0xff]  ;;  %v57_v55 = vld [vmem:[#allocation2 + $0x58] sm:$0xff] }
  0x30   :  { %170 = vmatprep.subr.mxu0 %v125_v17  ;;  %773 = vmatprep.subr.mxu1 %v125_v17  ;;  %v87_v52 = vld [vmem:[#allocation2 + $0x148] sm:$0xff]  ;;  %v88_v54 = vld [vmem:[#allocation2 + $0x150] sm:$0xff]  ;;  %v89_v56 = vld [vmem:[#allocation2 + $0x158] sm:$0xff] }
  0x31   :  { %171 = vmatpush1.msra.mxu0 %v124_v18  ;;  %789 = vmatpush1.msra.mxu1 %v124_v18  ;;  %v58_v57 = vld [vmem:[#allocation2 + $0x60] sm:$0xff]  ;;  %v59_v59 = vld [vmem:[#allocation2 + $0x68] sm:$0xff]  ;;  %v60_v61 = vld [vmem:[#allocation2 + $0x70] sm:$0xff] }
  0x32   :  { %172 = vmatprep.subr.mxu0 %v123_v19  ;;  %774 = vmatprep.subr.mxu1 %v123_v19  ;;  %v90_v58 = vld [vmem:[#allocation2 + $0x160] sm:$0xff]  ;;  %v91_v60 = vld [vmem:[#allocation2 + $0x168] sm:$0xff]  ;;  %v92_v62 = vld [vmem:[#allocation2 + $0x170] sm:$0xff] }
  0x33   :  { %173 = vmatpush1.msra.mxu0 %v122_v20  ;;  %790 = vmatpush1.msra.mxu1 %v122_v20  ;;  %v61_v63 = vld [vmem:[#allocation2 + $0x78] sm:$0xff]  ;;  %v62_v2 = vld [vmem:[#allocation2 + $0x80] sm:$0xff]  ;;  %v63_v4 = vld [vmem:[#allocation2 + $0x88] sm:$0xff] }
  0x34   :  { %174 = vmatprep.subr.mxu0 %v121_v21  ;;  %775 = vmatprep.subr.mxu1 %v121_v21  ;;  %v93_v1 = vld [vmem:[#allocation2 + $0x178] sm:$0xff]  ;;  %v94_v3 = vld [vmem:[#allocation2 + $0x180] sm:$0xff]  ;;  %v95_v5 = vld [vmem:[#allocation2 + $0x188] sm:$0xff] }
  0x35   :  { %175 = vmatpush1.msra.mxu0 %v120_v22  ;;  %791 = vmatpush1.msra.mxu1 %v120_v22  ;;  %v64_v6 = vld [vmem:[#allocation2 + $0x90] sm:$0xff]  ;;  %v65_v8 = vld [vmem:[#allocation2 + $0x98] sm:$0xff]  ;;  %v66_v10 = vld [vmem:[#allocation2 + $0xa0] sm:$0xff] }
  0x36   :  { %176 = vmatprep.subr.mxu0 %v119_v23  ;;  %776 = vmatprep.subr.mxu1 %v119_v23  ;;  %v96_v7 = vld [vmem:[#allocation2 + $0x190] sm:$0xff]  ;;  %v97_v9 = vld [vmem:[#allocation2 + $0x198] sm:$0xff]  ;;  %v98_v11 = vld [vmem:[#allocation2 + $0x1a0] sm:$0xff] }
  0x37   :  { %177 = vmatpush1.msra.mxu0 %v118_v24  ;;  %792 = vmatpush1.msra.mxu1 %v118_v24  ;;  %v67_v12 = vld [vmem:[#allocation2 + $0xa8] sm:$0xff]  ;;  %v68_v14 = vld [vmem:[#allocation2 + $0xb0] sm:$0xff]  ;;  %v69_v16 = vld [vmem:[#allocation2 + $0xb8] sm:$0xff] }
  0x38   :  { %178 = vmatprep.subr.mxu0 %v117_v25  ;;  %777 = vmatprep.subr.mxu1 %v117_v25  ;;  %v99_v13 = vld [vmem:[#allocation2 + $0x1a8] sm:$0xff]  ;;  %v100_v15 = vld [vmem:[#allocation2 + $0x1b0] sm:$0xff]  ;;  %v101_v17 = vld [vmem:[#allocation2 + $0x1b8] sm:$0xff] }
  0x39   :  { %179 = vmatpush1.msra.mxu0 %v116_v26  ;;  %793 = vmatpush1.msra.mxu1 %v116_v26  ;;  %v70_v18 = vld [vmem:[#allocation2 + $0xc0] sm:$0xff]  ;;  %v71_v20 = vld [vmem:[#allocation2 + $0xc8] sm:$0xff]  ;;  %v72_v22 = vld [vmem:[#allocation2 + $0xd0] sm:$0xff] }
  0x3a   :  { %180 = vmatprep.subr.mxu0 %v115_v27  ;;  %778 = vmatprep.subr.mxu1 %v115_v27  ;;  %v102_v19 = vld [vmem:[#allocation2 + $0x1c0] sm:$0xff]  ;;  %v103_v21 = vld [vmem:[#allocation2 + $0x1c8] sm:$0xff]  ;;  %v104_v23 = vld [vmem:[#allocation2 + $0x1d0] sm:$0xff] }
  0x3b   :  { %181 = vmatpush1.msra.mxu0 %v114_v28  ;;  %794 = vmatpush1.msra.mxu1 %v114_v28  ;;  %v73_v24 = vld [vmem:[#allocation2 + $0xd8] sm:$0xff]  ;;  %v74_v26 = vld [vmem:[#allocation2 + $0xe0] sm:$0xff]  ;;  %v75_v28 = vld [vmem:[#allocation2 + $0xe8] sm:$0xff] }
  0x3c   :  { %182 = vmatprep.subr.mxu0 %v113_v29  ;;  %779 = vmatprep.subr.mxu1 %v113_v29  ;;  %v105_v25 = vld [vmem:[#allocation2 + $0x1d8] sm:$0xff]  ;;  %v106_v27 = vld [vmem:[#allocation2 + $0x1e0] sm:$0xff]  ;;  %v107_v29 = vld [vmem:[#allocation2 + $0x1e8] sm:$0xff] }
  0x3d   :  { %183 = vmatpush1.msra.mxu0 %v112_v30  ;;  %795 = vmatpush1.msra.mxu1 %v112_v30  ;;  %v76_v30 = vld [vmem:[#allocation2 + $0xf0] sm:$0xff] }
  0x3e   :  { %184 = vmatprep.subr.mxu0 %v111_v31  ;;  %780 = vmatprep.subr.mxu1 %v111_v31  ;;  %v108_v31 = vld [vmem:[#allocation2 + $0x1f0] sm:$0xff] }
  0x3f   :  { %185 = vmatpush1.msra.mxu0 %v110_v32  ;;  %796 = vmatpush1.msra.mxu1 %v110_v32  ;;  %v77_v32 = vld [vmem:[#allocation2 + $0xf8] sm:$0xff] }
  0x40   :  { %219 = vmatmul.mubr.f32.vlgmr.msra.gmra.mxu0 %v46_v33  ;;  %411 = vmatmul.mubr.f32.vlgmr.msra.gmra.mxu1 %v78_v34  ;;  %v109_v33 = vld [vmem:[#allocation2 + $0x1f8] sm:$0xff]  ;;  %v144_v34 = vlaneseq }
  0x41   :  { %224 = vmatprep.mubr.f32.mxu0 %v900_v0  ;;  %416 = vmatprep.mubr.f32.mxu1 %v900_v0 }
  0x44   :  { %225 = vmatmul.mubr.f32.gmra.mxu0 %v47_v35  ;;  %417 = vmatmul.mubr.f32.gmra.mxu1 %v79_v36  ;;  %v145_v35 = vshrl.u32 %v144_v34, 7 }
  0x45   :  { %230 = vmatprep.mubr.f32.mxu0 %v900_v0  ;;  %422 = vmatprep.mubr.f32.mxu1 %v900_v0 }
  0x46   :  { %v146_v36 = vsub.s32 0, %v145_v35 }
  0x48   :  { %231 = vmatmul.mubr.f32.gmra.mxu0 %v48_v37  ;;  %423 = vmatmul.mubr.f32.gmra.mxu1 %v80_v38  ;;  %v142_v37 = vld [vmem:[%s1150_s2] sm:$0x3]  ;;  %v150_v38 = vsub.s32 1, %v145_v35  ;;  %s901_s2 = smov [#allocation7]  }
  0x49   :  { %236 = vmatprep.mubr.f32.mxu0 %v900_v0  ;;  %428 = vmatprep.mubr.f32.mxu1 %v900_v0  ;;  %s736_s29 = sshll.u32 %s901_s2, 4  ;;  %s737_s29 = int_to_ptr.vmem [resolvable:$true] %s736_s29 }
  0x4a   :  { %s846_s6 = scalar_lea.vmem %s737_s29, 8192  ;;  %p851_p11 = scmp.lt.s32.totalorder %s737_s29, %s737_s29 }
  0x4b   :  { %p847_p10 = scmp.ne.s32.totalorder %s737_s29, %s846_s6  ;;  %p852_p12 = scmp.lt.s32.totalorder %s846_s6, %s846_s6 }
  0x4c   :  { %237 = vmatmul.mubr.f32.gmra.mxu0 %v49_v39  ;;  %429 = vmatmul.mubr.f32.gmra.mxu1 %v81_v40  ;;  %v1004_v39 = vrot.slane %v142_v37, %v146_v36  ;;  %v1006_v40 = vrot.slane %v142_v37, %v150_v38 }
  0x4d   :  { %242 = vmatprep.mubr.f32.mxu0 %v900_v0  ;;  %434 = vmatprep.mubr.f32.mxu1 %v900_v0  ;;  %p853_p13 = por %p852_p12, %p851_p11 }
  0x4f   :  { %p854_p0 = pnand %p853_p13, %p847_p10 }
  0x50   :  { %243 = vmatmul.mubr.f32.gmra.mxu0 %v50_v41  ;;  %435 = vmatmul.mubr.f32.gmra.mxu1 %v82_v42 }
  0x51   :  { %248 = vmatprep.mubr.f32.mxu0 %v900_v0  ;;  %440 = vmatprep.mubr.f32.mxu1 %v900_v0 }
  0x54   :  { %249 = vmatmul.mubr.f32.gmra.mxu0 %v51_v43  ;;  %441 = vmatmul.mubr.f32.gmra.mxu1 %v83_v44 }
  0x55   :  { %254 = vmatprep.mubr.f32.mxu0 %v900_v0  ;;  %446 = vmatprep.mubr.f32.mxu1 %v900_v0 }
  0x58   :  { %255 = vmatmul.mubr.f32.gmra.mxu0 %v52_v45  ;;  %447 = vmatmul.mubr.f32.gmra.mxu1 %v84_v46 }
  0x59   :  { %260 = vmatprep.mubr.f32.mxu0 %v900_v0  ;;  %452 = vmatprep.mubr.f32.mxu1 %v900_v0 }
  0x5c   :  { %261 = vmatmul.mubr.f32.gmra.mxu0 %v53_v47  ;;  %453 = vmatmul.mubr.f32.gmra.mxu1 %v85_v48 }
  0x5d   :  { %266 = vmatprep.mubr.f32.mxu0 %v900_v0  ;;  %458 = vmatprep.mubr.f32.mxu1 %v900_v0 }
  0x60   :  { %267 = vmatmul.mubr.f32.gmra.mxu0 %v54_v49  ;;  %459 = vmatmul.mubr.f32.gmra.mxu1 %v86_v50 }
  0x61   :  { %272 = vmatprep.mubr.f32.mxu0 %v900_v0  ;;  %464 = vmatprep.mubr.f32.mxu1 %v900_v0 }
  0x64   :  { %273 = vmatmul.mubr.f32.gmra.mxu0 %v55_v51  ;;  %465 = vmatmul.mubr.f32.gmra.mxu1 %v87_v52 }
  0x65   :  { %278 = vmatprep.mubr.f32.mxu0 %v900_v0  ;;  %470 = vmatprep.mubr.f32.mxu1 %v900_v0 }
  0x68   :  { %279 = vmatmul.mubr.f32.gmra.mxu0 %v56_v53  ;;  %471 = vmatmul.mubr.f32.gmra.mxu1 %v88_v54 }
  0x69   :  { %284 = vmatprep.mubr.f32.mxu0 %v900_v0  ;;  %476 = vmatprep.mubr.f32.mxu1 %v900_v0 }
  0x6c   :  { %285 = vmatmul.mubr.f32.gmra.mxu0 %v57_v55  ;;  %477 = vmatmul.mubr.f32.gmra.mxu1 %v89_v56 }
  0x6d   :  { %290 = vmatprep.mubr.f32.mxu0 %v900_v0  ;;  %482 = vmatprep.mubr.f32.mxu1 %v900_v0 }
  0x70   :  { %291 = vmatmul.mubr.f32.gmra.mxu0 %v58_v57  ;;  %483 = vmatmul.mubr.f32.gmra.mxu1 %v90_v58 }
  0x71   :  { %296 = vmatprep.mubr.f32.mxu0 %v900_v0  ;;  %488 = vmatprep.mubr.f32.mxu1 %v900_v0 }
  0x74   :  { %297 = vmatmul.mubr.f32.gmra.mxu0 %v59_v59  ;;  %489 = vmatmul.mubr.f32.gmra.mxu1 %v91_v60 }
  0x75   :  { %302 = vmatprep.mubr.f32.mxu0 %v900_v0  ;;  %494 = vmatprep.mubr.f32.mxu1 %v900_v0 }
  0x78   :  { %303 = vmatmul.mubr.f32.gmra.mxu0 %v60_v61  ;;  %495 = vmatmul.mubr.f32.gmra.mxu1 %v92_v62 }
  0x79   :  { %308 = vmatprep.mubr.f32.mxu0 %v900_v0  ;;  %500 = vmatprep.mubr.f32.mxu1 %v900_v0 }
  0x7c   :  { %309 = vmatmul.mubr.f32.gmra.mxu0 %v61_v63  ;;  %501 = vmatmul.mubr.f32.gmra.mxu1 %v93_v1 }
  0x7d   :  { %314 = vmatprep.mubr.f32.mxu0 %v900_v0  ;;  %506 = vmatprep.mubr.f32.mxu1 %v900_v0 }
  0x80   :  { %315 = vmatmul.mubr.f32.gmra.mxu0 %v62_v2  ;;  %507 = vmatmul.mubr.f32.gmra.mxu1 %v94_v3 }
  0x81   :  { %320 = vmatprep.mubr.f32.mxu0 %v900_v0  ;;  %512 = vmatprep.mubr.f32.mxu1 %v900_v0 }
  0x84   :  { %321 = vmatmul.mubr.f32.gmra.mxu0 %v63_v4  ;;  %513 = vmatmul.mubr.f32.gmra.mxu1 %v95_v5 }
  0x85   :  { %326 = vmatprep.mubr.f32.mxu0 %v900_v0  ;;  %518 = vmatprep.mubr.f32.mxu1 %v900_v0 }
  0x88   :  { %327 = vmatmul.mubr.f32.gmra.mxu0 %v64_v6  ;;  %519 = vmatmul.mubr.f32.gmra.mxu1 %v96_v7 }
  0x89   :  { %332 = vmatprep.mubr.f32.mxu0 %v900_v0  ;;  %524 = vmatprep.mubr.f32.mxu1 %v900_v0 }
  0x8c   :  { %333 = vmatmul.mubr.f32.gmra.mxu0 %v65_v8  ;;  %525 = vmatmul.mubr.f32.gmra.mxu1 %v97_v9 }
  0x8d   :  { %338 = vmatprep.mubr.f32.mxu0 %v900_v0  ;;  %530 = vmatprep.mubr.f32.mxu1 %v900_v0 }
  0x90   :  { %339 = vmatmul.mubr.f32.gmra.mxu0 %v66_v10  ;;  %531 = vmatmul.mubr.f32.gmra.mxu1 %v98_v11 }
  0x91   :  { %344 = vmatprep.mubr.f32.mxu0 %v900_v0  ;;  %536 = vmatprep.mubr.f32.mxu1 %v900_v0 }
  0x94   :  { %345 = vmatmul.mubr.f32.gmra.mxu0 %v67_v12  ;;  %537 = vmatmul.mubr.f32.gmra.mxu1 %v99_v13 }
  0x95   :  { %350 = vmatprep.mubr.f32.mxu0 %v900_v0  ;;  %542 = vmatprep.mubr.f32.mxu1 %v900_v0 }
  0x98   :  { %351 = vmatmul.mubr.f32.gmra.mxu0 %v68_v14  ;;  %543 = vmatmul.mubr.f32.gmra.mxu1 %v100_v15 }
  0x99   :  { %356 = vmatprep.mubr.f32.mxu0 %v900_v0  ;;  %548 = vmatprep.mubr.f32.mxu1 %v900_v0 }
  0x9c   :  { %357 = vmatmul.mubr.f32.gmra.mxu0 %v69_v16  ;;  %549 = vmatmul.mubr.f32.gmra.mxu1 %v101_v17 }
  0x9d   :  { %362 = vmatprep.mubr.f32.mxu0 %v900_v0  ;;  %554 = vmatprep.mubr.f32.mxu1 %v900_v0 }
  0xa0   :  { %363 = vmatmul.mubr.f32.gmra.mxu0 %v70_v18  ;;  %555 = vmatmul.mubr.f32.gmra.mxu1 %v102_v19 }
  0xa1   :  { %368 = vmatprep.mubr.f32.mxu0 %v900_v0  ;;  %560 = vmatprep.mubr.f32.mxu1 %v900_v0 }
  0xa4   :  { %369 = vmatmul.mubr.f32.gmra.mxu0 %v71_v20  ;;  %561 = vmatmul.mubr.f32.gmra.mxu1 %v103_v21 }
  0xa5   :  { %374 = vmatprep.mubr.f32.mxu0 %v900_v0  ;;  %566 = vmatprep.mubr.f32.mxu1 %v900_v0 }
  0xa8   :  { %375 = vmatmul.mubr.f32.gmra.mxu0 %v72_v22  ;;  %567 = vmatmul.mubr.f32.gmra.mxu1 %v104_v23 }
  0xa9   :  { %380 = vmatprep.mubr.f32.mxu0 %v900_v0  ;;  %572 = vmatprep.mubr.f32.mxu1 %v900_v0 }
  0xac   :  { %381 = vmatmul.mubr.f32.gmra.mxu0 %v73_v24  ;;  %573 = vmatmul.mubr.f32.gmra.mxu1 %v105_v25 }
  0xad   :  { %386 = vmatprep.mubr.f32.mxu0 %v900_v0  ;;  %578 = vmatprep.mubr.f32.mxu1 %v900_v0 }
  0xb0   :  { %387 = vmatmul.mubr.f32.gmra.mxu0 %v74_v26  ;;  %579 = vmatmul.mubr.f32.gmra.mxu1 %v106_v27 }
  0xb1   :  { %392 = vmatprep.mubr.f32.mxu0 %v900_v0  ;;  %584 = vmatprep.mubr.f32.mxu1 %v900_v0 }
  0xb4   :  { %393 = vmatmul.mubr.f32.gmra.mxu0 %v75_v28  ;;  %585 = vmatmul.mubr.f32.gmra.mxu1 %v107_v29 }
  0xb5   :  { %398 = vmatprep.mubr.f32.mxu0 %v900_v0  ;;  %590 = vmatprep.mubr.f32.mxu1 %v900_v0 }
  0xb8   :  { %399 = vmatmul.mubr.f32.gmra.mxu0 %v76_v30  ;;  %591 = vmatmul.mubr.f32.gmra.mxu1 %v108_v31 }
  0xb9   :  { %404 = vmatprep.mubr.f32.mxu0 %v900_v0  ;;  %596 = vmatprep.mubr.f32.mxu1 %v900_v0 }
  0xbc   :  { %405 = vmatmul.mubr.f32.gmra.mxu0 %v77_v32  ;;  %597 = vmatmul.mubr.f32.gmra.mxu1 %v109_v33 }
 0x100   :  { %v220_v41 = vpop.f32.mrf.mxu0  ;;  %v412_v42 = vpop.f32.mrf.mxu1 }
 0x101   :  { %v221_v0 = vadd.f32 %v220_v41, %v1004_v39  ;;  %v413_v43 = vadd.f32 %v412_v42, %v1004_v39 }
 0x102   :  { %v222_v44 = vpop.f32.mrf.mxu0  ;;  %v414_v45 = vpop.f32.mrf.mxu1 }
 0x103   :  { %603 = vst [vmem:[#allocation7] sm:$0xff] %v221_v0  ;;  %635 = vst [vmem:[#allocation7 + $0x100] sm:$0xff] %v413_v43  ;;  %v223_v46 = vadd.f32 %v222_v44, %v1006_v40  ;;  %v415_v47 = vadd.f32 %v414_v45, %v1006_v40 }
 0x104   :  { %v226_v48 = vpop.f32.mrf.mxu0  ;;  %v418_v49 = vpop.f32.mrf.mxu1 }
 0x105   :  { %667 = vst [vmem:[#allocation8] sm:$0xff] %v223_v46  ;;  %699 = vst [vmem:[#allocation8 + $0x100] sm:$0xff] %v415_v47  ;;  %v227_v50 = vadd.f32 %v226_v48, %v1004_v39  ;;  %v419_v51 = vadd.f32 %v418_v49, %v1004_v39 }
 0x106   :  { %v228_v52 = vpop.f32.mrf.mxu0  ;;  %v420_v53 = vpop.f32.mrf.mxu1 }
 0x107   :  { %604 = vst [vmem:[#allocation7 + $0x8] sm:$0xff] %v227_v50  ;;  %636 = vst [vmem:[#allocation7 + $0x108] sm:$0xff] %v419_v51  ;;  %v229_v54 = vadd.f32 %v228_v52, %v1006_v40  ;;  %v421_v55 = vadd.f32 %v420_v53, %v1006_v40 }
 0x108   :  { %v232_v56 = vpop.f32.mrf.mxu0  ;;  %v424_v57 = vpop.f32.mrf.mxu1 }
 0x109   :  { %668 = vst [vmem:[#allocation8 + $0x8] sm:$0xff] %v229_v54  ;;  %700 = vst [vmem:[#allocation8 + $0x108] sm:$0xff] %v421_v55  ;;  %v233_v58 = vadd.f32 %v232_v56, %v1004_v39  ;;  %v425_v59 = vadd.f32 %v424_v57, %v1004_v39 }
 0x10a   :  { %v234_v60 = vpop.f32.mrf.mxu0  ;;  %v426_v61 = vpop.f32.mrf.mxu1 }
 0x10b   :  { %605 = vst [vmem:[#allocation7 + $0x10] sm:$0xff] %v233_v58  ;;  %637 = vst [vmem:[#allocation7 + $0x110] sm:$0xff] %v425_v59  ;;  %v235_v62 = vadd.f32 %v234_v60, %v1006_v40  ;;  %v427_v63 = vadd.f32 %v426_v61, %v1006_v40 }
 0x10c   :  { %v238_v1 = vpop.f32.mrf.mxu0  ;;  %v430_v2 = vpop.f32.mrf.mxu1 }
 0x10d   :  { %669 = vst [vmem:[#allocation8 + $0x10] sm:$0xff] %v235_v62  ;;  %701 = vst [vmem:[#allocation8 + $0x110] sm:$0xff] %v427_v63  ;;  %v239_v3 = vadd.f32 %v238_v1, %v1004_v39  ;;  %v431_v4 = vadd.f32 %v430_v2, %v1004_v39 }
 0x10e   :  { %v240_v5 = vpop.f32.mrf.mxu0  ;;  %v432_v6 = vpop.f32.mrf.mxu1 }
 0x10f   :  { %606 = vst [vmem:[#allocation7 + $0x18] sm:$0xff] %v239_v3  ;;  %638 = vst [vmem:[#allocation7 + $0x118] sm:$0xff] %v431_v4  ;;  %v241_v7 = vadd.f32 %v240_v5, %v1006_v40  ;;  %v433_v8 = vadd.f32 %v432_v6, %v1006_v40 }
 0x110   :  { %v244_v9 = vpop.f32.mrf.mxu0  ;;  %v436_v10 = vpop.f32.mrf.mxu1 }
 0x111   :  { %670 = vst [vmem:[#allocation8 + $0x18] sm:$0xff] %v241_v7  ;;  %702 = vst [vmem:[#allocation8 + $0x118] sm:$0xff] %v433_v8  ;;  %v245_v11 = vadd.f32 %v244_v9, %v1004_v39  ;;  %v437_v12 = vadd.f32 %v436_v10, %v1004_v39 }
 0x112   :  { %v246_v13 = vpop.f32.mrf.mxu0  ;;  %v438_v14 = vpop.f32.mrf.mxu1 }
 0x113   :  { %607 = vst [vmem:[#allocation7 + $0x20] sm:$0xff] %v245_v11  ;;  %639 = vst [vmem:[#allocation7 + $0x120] sm:$0xff] %v437_v12  ;;  %v247_v15 = vadd.f32 %v246_v13, %v1006_v40  ;;  %v439_v16 = vadd.f32 %v438_v14, %v1006_v40 }
 0x114   :  { %v250_v17 = vpop.f32.mrf.mxu0  ;;  %v442_v18 = vpop.f32.mrf.mxu1 }
 0x115   :  { %671 = vst [vmem:[#allocation8 + $0x20] sm:$0xff] %v247_v15  ;;  %703 = vst [vmem:[#allocation8 + $0x120] sm:$0xff] %v439_v16  ;;  %v251_v19 = vadd.f32 %v250_v17, %v1004_v39  ;;  %v443_v20 = vadd.f32 %v442_v18, %v1004_v39 }
 0x116   :  { %v252_v21 = vpop.f32.mrf.mxu0  ;;  %v444_v22 = vpop.f32.mrf.mxu1 }
 0x117   :  { %608 = vst [vmem:[#allocation7 + $0x28] sm:$0xff] %v251_v19  ;;  %640 = vst [vmem:[#allocation7 + $0x128] sm:$0xff] %v443_v20  ;;  %v253_v23 = vadd.f32 %v252_v21, %v1006_v40  ;;  %v445_v24 = vadd.f32 %v444_v22, %v1006_v40 }
 0x118   :  { %v256_v25 = vpop.f32.mrf.mxu0  ;;  %v448_v26 = vpop.f32.mrf.mxu1 }
 0x119   :  { %672 = vst [vmem:[#allocation8 + $0x28] sm:$0xff] %v253_v23  ;;  %704 = vst [vmem:[#allocation8 + $0x128] sm:$0xff] %v445_v24  ;;  %v257_v27 = vadd.f32 %v256_v25, %v1004_v39  ;;  %v449_v28 = vadd.f32 %v448_v26, %v1004_v39 }
 0x11a   :  { %v258_v29 = vpop.f32.mrf.mxu0  ;;  %v450_v30 = vpop.f32.mrf.mxu1 }
 0x11b   :  { %609 = vst [vmem:[#allocation7 + $0x30] sm:$0xff] %v257_v27  ;;  %641 = vst [vmem:[#allocation7 + $0x130] sm:$0xff] %v449_v28  ;;  %v259_v31 = vadd.f32 %v258_v29, %v1006_v40  ;;  %v451_v32 = vadd.f32 %v450_v30, %v1006_v40 }
 0x11c   :  { %v262_v33 = vpop.f32.mrf.mxu0  ;;  %v454_v34 = vpop.f32.mrf.mxu1 }
 0x11d   :  { %673 = vst [vmem:[#allocation8 + $0x30] sm:$0xff] %v259_v31  ;;  %705 = vst [vmem:[#allocation8 + $0x130] sm:$0xff] %v451_v32  ;;  %v263_v35 = vadd.f32 %v262_v33, %v1004_v39  ;;  %v455_v36 = vadd.f32 %v454_v34, %v1004_v39 }
 0x11e   :  { %v264_v37 = vpop.f32.mrf.mxu0  ;;  %v456_v38 = vpop.f32.mrf.mxu1 }
 0x11f   :  { %610 = vst [vmem:[#allocation7 + $0x38] sm:$0xff] %v263_v35  ;;  %642 = vst [vmem:[#allocation7 + $0x138] sm:$0xff] %v455_v36  ;;  %v265_v41 = vadd.f32 %v264_v37, %v1006_v40  ;;  %v457_v42 = vadd.f32 %v456_v38, %v1006_v40 }
 0x120   :  { %v268_v0 = vpop.f32.mrf.mxu0  ;;  %v460_v43 = vpop.f32.mrf.mxu1 }
 0x121   :  { %674 = vst [vmem:[#allocation8 + $0x38] sm:$0xff] %v265_v41  ;;  %706 = vst [vmem:[#allocation8 + $0x138] sm:$0xff] %v457_v42  ;;  %v269_v44 = vadd.f32 %v268_v0, %v1004_v39  ;;  %v461_v45 = vadd.f32 %v460_v43, %v1004_v39 }
 0x122   :  { %v270_v46 = vpop.f32.mrf.mxu0  ;;  %v462_v47 = vpop.f32.mrf.mxu1 }
 0x123   :  { %611 = vst [vmem:[#allocation7 + $0x40] sm:$0xff] %v269_v44  ;;  %643 = vst [vmem:[#allocation7 + $0x140] sm:$0xff] %v461_v45  ;;  %v271_v48 = vadd.f32 %v270_v46, %v1006_v40  ;;  %v463_v49 = vadd.f32 %v462_v47, %v1006_v40 }
 0x124   :  { %v274_v50 = vpop.f32.mrf.mxu0  ;;  %v466_v51 = vpop.f32.mrf.mxu1 }
 0x125   :  { %675 = vst [vmem:[#allocation8 + $0x40] sm:$0xff] %v271_v48  ;;  %707 = vst [vmem:[#allocation8 + $0x140] sm:$0xff] %v463_v49  ;;  %v275_v52 = vadd.f32 %v274_v50, %v1004_v39  ;;  %v467_v53 = vadd.f32 %v466_v51, %v1004_v39 }
 0x126   :  { %v276_v54 = vpop.f32.mrf.mxu0  ;;  %v468_v55 = vpop.f32.mrf.mxu1 }
 0x127   :  { %612 = vst [vmem:[#allocation7 + $0x48] sm:$0xff] %v275_v52  ;;  %644 = vst [vmem:[#allocation7 + $0x148] sm:$0xff] %v467_v53  ;;  %v277_v56 = vadd.f32 %v276_v54, %v1006_v40  ;;  %v469_v57 = vadd.f32 %v468_v55, %v1006_v40 }
 0x128   :  { %v280_v58 = vpop.f32.mrf.mxu0  ;;  %v472_v59 = vpop.f32.mrf.mxu1 }
 0x129   :  { %676 = vst [vmem:[#allocation8 + $0x48] sm:$0xff] %v277_v56  ;;  %708 = vst [vmem:[#allocation8 + $0x148] sm:$0xff] %v469_v57  ;;  %v281_v60 = vadd.f32 %v280_v58, %v1004_v39  ;;  %v473_v61 = vadd.f32 %v472_v59, %v1004_v39 }
 0x12a   :  { %v282_v62 = vpop.f32.mrf.mxu0  ;;  %v474_v63 = vpop.f32.mrf.mxu1 }
 0x12b   :  { %613 = vst [vmem:[#allocation7 + $0x50] sm:$0xff] %v281_v60  ;;  %645 = vst [vmem:[#allocation7 + $0x150] sm:$0xff] %v473_v61  ;;  %v283_v1 = vadd.f32 %v282_v62, %v1006_v40  ;;  %v475_v2 = vadd.f32 %v474_v63, %v1006_v40 }
 0x12c   :  { %v286_v3 = vpop.f32.mrf.mxu0  ;;  %v478_v4 = vpop.f32.mrf.mxu1 }
 0x12d   :  { %677 = vst [vmem:[#allocation8 + $0x50] sm:$0xff] %v283_v1  ;;  %709 = vst [vmem:[#allocation8 + $0x150] sm:$0xff] %v475_v2  ;;  %v287_v5 = vadd.f32 %v286_v3, %v1004_v39  ;;  %v479_v6 = vadd.f32 %v478_v4, %v1004_v39 }
 0x12e   :  { %v288_v7 = vpop.f32.mrf.mxu0  ;;  %v480_v8 = vpop.f32.mrf.mxu1 }
 0x12f   :  { %614 = vst [vmem:[#allocation7 + $0x58] sm:$0xff] %v287_v5  ;;  %646 = vst [vmem:[#allocation7 + $0x158] sm:$0xff] %v479_v6  ;;  %v289_v9 = vadd.f32 %v288_v7, %v1006_v40  ;;  %v481_v10 = vadd.f32 %v480_v8, %v1006_v40 }
 0x130   :  { %v292_v11 = vpop.f32.mrf.mxu0  ;;  %v484_v12 = vpop.f32.mrf.mxu1 }
 0x131   :  { %678 = vst [vmem:[#allocation8 + $0x58] sm:$0xff] %v289_v9  ;;  %710 = vst [vmem:[#allocation8 + $0x158] sm:$0xff] %v481_v10  ;;  %v293_v13 = vadd.f32 %v292_v11, %v1004_v39  ;;  %v485_v14 = vadd.f32 %v484_v12, %v1004_v39 }
 0x132   :  { %v294_v15 = vpop.f32.mrf.mxu0  ;;  %v486_v16 = vpop.f32.mrf.mxu1 }
 0x133   :  { %615 = vst [vmem:[#allocation7 + $0x60] sm:$0xff] %v293_v13  ;;  %647 = vst [vmem:[#allocation7 + $0x160] sm:$0xff] %v485_v14  ;;  %v295_v17 = vadd.f32 %v294_v15, %v1006_v40  ;;  %v487_v18 = vadd.f32 %v486_v16, %v1006_v40 }
 0x134   :  { %v298_v19 = vpop.f32.mrf.mxu0  ;;  %v490_v20 = vpop.f32.mrf.mxu1 }
 0x135   :  { %679 = vst [vmem:[#allocation8 + $0x60] sm:$0xff] %v295_v17  ;;  %711 = vst [vmem:[#allocation8 + $0x160] sm:$0xff] %v487_v18  ;;  %v299_v21 = vadd.f32 %v298_v19, %v1004_v39  ;;  %v491_v22 = vadd.f32 %v490_v20, %v1004_v39 }
 0x136   :  { %v300_v23 = vpop.f32.mrf.mxu0  ;;  %v492_v24 = vpop.f32.mrf.mxu1 }
 0x137   :  { %616 = vst [vmem:[#allocation7 + $0x68] sm:$0xff] %v299_v21  ;;  %648 = vst [vmem:[#allocation7 + $0x168] sm:$0xff] %v491_v22  ;;  %v301_v25 = vadd.f32 %v300_v23, %v1006_v40  ;;  %v493_v26 = vadd.f32 %v492_v24, %v1006_v40 }
 0x138   :  { %v304_v27 = vpop.f32.mrf.mxu0  ;;  %v496_v28 = vpop.f32.mrf.mxu1 }
 0x139   :  { %680 = vst [vmem:[#allocation8 + $0x68] sm:$0xff] %v301_v25  ;;  %712 = vst [vmem:[#allocation8 + $0x168] sm:$0xff] %v493_v26  ;;  %v305_v29 = vadd.f32 %v304_v27, %v1004_v39  ;;  %v497_v30 = vadd.f32 %v496_v28, %v1004_v39 }
 0x13a   :  { %v306_v31 = vpop.f32.mrf.mxu0  ;;  %v498_v32 = vpop.f32.mrf.mxu1 }
 0x13b   :  { %617 = vst [vmem:[#allocation7 + $0x70] sm:$0xff] %v305_v29  ;;  %649 = vst [vmem:[#allocation7 + $0x170] sm:$0xff] %v497_v30  ;;  %v307_v33 = vadd.f32 %v306_v31, %v1006_v40  ;;  %v499_v34 = vadd.f32 %v498_v32, %v1006_v40 }
 0x13c   :  { %v310_v35 = vpop.f32.mrf.mxu0  ;;  %v502_v36 = vpop.f32.mrf.mxu1 }
 0x13d   :  { %681 = vst [vmem:[#allocation8 + $0x70] sm:$0xff] %v307_v33  ;;  %713 = vst [vmem:[#allocation8 + $0x170] sm:$0xff] %v499_v34  ;;  %v311_v37 = vadd.f32 %v310_v35, %v1004_v39  ;;  %v503_v38 = vadd.f32 %v502_v36, %v1004_v39 }
 0x13e   :  { %v312_v41 = vpop.f32.mrf.mxu0  ;;  %v504_v42 = vpop.f32.mrf.mxu1 }
 0x13f   :  { %618 = vst [vmem:[#allocation7 + $0x78] sm:$0xff] %v311_v37  ;;  %650 = vst [vmem:[#allocation7 + $0x178] sm:$0xff] %v503_v38  ;;  %v313_v0 = vadd.f32 %v312_v41, %v1006_v40  ;;  %v505_v43 = vadd.f32 %v504_v42, %v1006_v40 }
 0x140   :  { %v316_v44 = vpop.f32.mrf.mxu0  ;;  %v508_v45 = vpop.f32.mrf.mxu1 }
 0x141   :  { %682 = vst [vmem:[#allocation8 + $0x78] sm:$0xff] %v313_v0  ;;  %714 = vst [vmem:[#allocation8 + $0x178] sm:$0xff] %v505_v43  ;;  %v317_v46 = vadd.f32 %v316_v44, %v1004_v39  ;;  %v509_v47 = vadd.f32 %v508_v45, %v1004_v39 }
 0x142   :  { %v318_v48 = vpop.f32.mrf.mxu0  ;;  %v510_v49 = vpop.f32.mrf.mxu1 }
 0x143   :  { %619 = vst [vmem:[#allocation7 + $0x80] sm:$0xff] %v317_v46  ;;  %651 = vst [vmem:[#allocation7 + $0x180] sm:$0xff] %v509_v47  ;;  %v319_v50 = vadd.f32 %v318_v48, %v1006_v40  ;;  %v511_v51 = vadd.f32 %v510_v49, %v1006_v40 }
 0x144   :  { %v322_v52 = vpop.f32.mrf.mxu0  ;;  %v514_v53 = vpop.f32.mrf.mxu1 }
 0x145   :  { %683 = vst [vmem:[#allocation8 + $0x80] sm:$0xff] %v319_v50  ;;  %715 = vst [vmem:[#allocation8 + $0x180] sm:$0xff] %v511_v51  ;;  %v323_v54 = vadd.f32 %v322_v52, %v1004_v39  ;;  %v515_v55 = vadd.f32 %v514_v53, %v1004_v39 }
 0x146   :  { %v324_v56 = vpop.f32.mrf.mxu0  ;;  %v516_v57 = vpop.f32.mrf.mxu1 }
 0x147   :  { %620 = vst [vmem:[#allocation7 + $0x88] sm:$0xff] %v323_v54  ;;  %652 = vst [vmem:[#allocation7 + $0x188] sm:$0xff] %v515_v55  ;;  %v325_v58 = vadd.f32 %v324_v56, %v1006_v40  ;;  %v517_v59 = vadd.f32 %v516_v57, %v1006_v40 }
 0x148   :  { %v328_v60 = vpop.f32.mrf.mxu0  ;;  %v520_v61 = vpop.f32.mrf.mxu1 }
 0x149   :  { %684 = vst [vmem:[#allocation8 + $0x88] sm:$0xff] %v325_v58  ;;  %716 = vst [vmem:[#allocation8 + $0x188] sm:$0xff] %v517_v59  ;;  %v329_v62 = vadd.f32 %v328_v60, %v1004_v39  ;;  %v521_v63 = vadd.f32 %v520_v61, %v1004_v39 }
 0x14a   :  { %v330_v1 = vpop.f32.mrf.mxu0  ;;  %v522_v2 = vpop.f32.mrf.mxu1 }
 0x14b   :  { %621 = vst [vmem:[#allocation7 + $0x90] sm:$0xff] %v329_v62  ;;  %653 = vst [vmem:[#allocation7 + $0x190] sm:$0xff] %v521_v63  ;;  %v331_v3 = vadd.f32 %v330_v1, %v1006_v40  ;;  %v523_v4 = vadd.f32 %v522_v2, %v1006_v40 }
 0x14c   :  { %v334_v5 = vpop.f32.mrf.mxu0  ;;  %v526_v6 = vpop.f32.mrf.mxu1 }
 0x14d   :  { %685 = vst [vmem:[#allocation8 + $0x90] sm:$0xff] %v331_v3  ;;  %717 = vst [vmem:[#allocation8 + $0x190] sm:$0xff] %v523_v4  ;;  %v335_v7 = vadd.f32 %v334_v5, %v1004_v39  ;;  %v527_v8 = vadd.f32 %v526_v6, %v1004_v39 }
 0x14e   :  { %v336_v9 = vpop.f32.mrf.mxu0  ;;  %v528_v10 = vpop.f32.mrf.mxu1 }
 0x14f   :  { %622 = vst [vmem:[#allocation7 + $0x98] sm:$0xff] %v335_v7  ;;  %654 = vst [vmem:[#allocation7 + $0x198] sm:$0xff] %v527_v8  ;;  %v337_v11 = vadd.f32 %v336_v9, %v1006_v40  ;;  %v529_v12 = vadd.f32 %v528_v10, %v1006_v40 }
 0x150   :  { %v340_v13 = vpop.f32.mrf.mxu0  ;;  %v532_v14 = vpop.f32.mrf.mxu1 }
 0x151   :  { %686 = vst [vmem:[#allocation8 + $0x98] sm:$0xff] %v337_v11  ;;  %718 = vst [vmem:[#allocation8 + $0x198] sm:$0xff] %v529_v12  ;;  %v341_v15 = vadd.f32 %v340_v13, %v1004_v39  ;;  %v533_v16 = vadd.f32 %v532_v14, %v1004_v39 }
 0x152   :  { %v342_v17 = vpop.f32.mrf.mxu0  ;;  %v534_v18 = vpop.f32.mrf.mxu1 }
 0x153   :  { %623 = vst [vmem:[#allocation7 + $0xa0] sm:$0xff] %v341_v15  ;;  %655 = vst [vmem:[#allocation7 + $0x1a0] sm:$0xff] %v533_v16  ;;  %v343_v19 = vadd.f32 %v342_v17, %v1006_v40  ;;  %v535_v20 = vadd.f32 %v534_v18, %v1006_v40 }
 0x154   :  { %v346_v21 = vpop.f32.mrf.mxu0  ;;  %v538_v22 = vpop.f32.mrf.mxu1 }
 0x155   :  { %687 = vst [vmem:[#allocation8 + $0xa0] sm:$0xff] %v343_v19  ;;  %719 = vst [vmem:[#allocation8 + $0x1a0] sm:$0xff] %v535_v20  ;;  %v347_v23 = vadd.f32 %v346_v21, %v1004_v39  ;;  %v539_v24 = vadd.f32 %v538_v22, %v1004_v39 }
 0x156   :  { %v348_v25 = vpop.f32.mrf.mxu0  ;;  %v540_v26 = vpop.f32.mrf.mxu1 }
 0x157   :  { %624 = vst [vmem:[#allocation7 + $0xa8] sm:$0xff] %v347_v23  ;;  %656 = vst [vmem:[#allocation7 + $0x1a8] sm:$0xff] %v539_v24  ;;  %v349_v27 = vadd.f32 %v348_v25, %v1006_v40  ;;  %v541_v28 = vadd.f32 %v540_v26, %v1006_v40 }
 0x158   :  { %v352_v29 = vpop.f32.mrf.mxu0  ;;  %v544_v30 = vpop.f32.mrf.mxu1 }
 0x159   :  { %688 = vst [vmem:[#allocation8 + $0xa8] sm:$0xff] %v349_v27  ;;  %720 = vst [vmem:[#allocation8 + $0x1a8] sm:$0xff] %v541_v28  ;;  %v353_v31 = vadd.f32 %v352_v29, %v1004_v39  ;;  %v545_v32 = vadd.f32 %v544_v30, %v1004_v39 }
 0x15a   :  { %v354_v33 = vpop.f32.mrf.mxu0  ;;  %v546_v34 = vpop.f32.mrf.mxu1 }
 0x15b   :  { %625 = vst [vmem:[#allocation7 + $0xb0] sm:$0xff] %v353_v31  ;;  %657 = vst [vmem:[#allocation7 + $0x1b0] sm:$0xff] %v545_v32  ;;  %v355_v35 = vadd.f32 %v354_v33, %v1006_v40  ;;  %v547_v36 = vadd.f32 %v546_v34, %v1006_v40 }
 0x15c   :  { %v358_v37 = vpop.f32.mrf.mxu0  ;;  %v550_v38 = vpop.f32.mrf.mxu1 }
 0x15d   :  { %689 = vst [vmem:[#allocation8 + $0xb0] sm:$0xff] %v355_v35  ;;  %721 = vst [vmem:[#allocation8 + $0x1b0] sm:$0xff] %v547_v36  ;;  %v359_v41 = vadd.f32 %v358_v37, %v1004_v39  ;;  %v551_v42 = vadd.f32 %v550_v38, %v1004_v39 }
 0x15e   :  { %v360_v0 = vpop.f32.mrf.mxu0  ;;  %v552_v43 = vpop.f32.mrf.mxu1 }
 0x15f   :  { %626 = vst [vmem:[#allocation7 + $0xb8] sm:$0xff] %v359_v41  ;;  %658 = vst [vmem:[#allocation7 + $0x1b8] sm:$0xff] %v551_v42  ;;  %v361_v44 = vadd.f32 %v360_v0, %v1006_v40  ;;  %v553_v45 = vadd.f32 %v552_v43, %v1006_v40 }
 0x160   :  { %v364_v46 = vpop.f32.mrf.mxu0  ;;  %v556_v47 = vpop.f32.mrf.mxu1 }
 0x161   :  { %690 = vst [vmem:[#allocation8 + $0xb8] sm:$0xff] %v361_v44  ;;  %722 = vst [vmem:[#allocation8 + $0x1b8] sm:$0xff] %v553_v45  ;;  %v365_v48 = vadd.f32 %v364_v46, %v1004_v39  ;;  %v557_v49 = vadd.f32 %v556_v47, %v1004_v39 }
 0x162   :  { %v366_v50 = vpop.f32.mrf.mxu0  ;;  %v558_v51 = vpop.f32.mrf.mxu1 }
 0x163   :  { %627 = vst [vmem:[#allocation7 + $0xc0] sm:$0xff] %v365_v48  ;;  %659 = vst [vmem:[#allocation7 + $0x1c0] sm:$0xff] %v557_v49  ;;  %v367_v52 = vadd.f32 %v366_v50, %v1006_v40  ;;  %v559_v53 = vadd.f32 %v558_v51, %v1006_v40 }
 0x164   :  { %v370_v54 = vpop.f32.mrf.mxu0  ;;  %v562_v55 = vpop.f32.mrf.mxu1 }
 0x165   :  { %691 = vst [vmem:[#allocation8 + $0xc0] sm:$0xff] %v367_v52  ;;  %723 = vst [vmem:[#allocation8 + $0x1c0] sm:$0xff] %v559_v53  ;;  %v371_v56 = vadd.f32 %v370_v54, %v1004_v39  ;;  %v563_v57 = vadd.f32 %v562_v55, %v1004_v39 }
 0x166   :  { %v372_v58 = vpop.f32.mrf.mxu0  ;;  %v564_v59 = vpop.f32.mrf.mxu1 }
 0x167   :  { %628 = vst [vmem:[#allocation7 + $0xc8] sm:$0xff] %v371_v56  ;;  %660 = vst [vmem:[#allocation7 + $0x1c8] sm:$0xff] %v563_v57  ;;  %v373_v60 = vadd.f32 %v372_v58, %v1006_v40  ;;  %v565_v61 = vadd.f32 %v564_v59, %v1006_v40 }
 0x168   :  { %v376_v62 = vpop.f32.mrf.mxu0  ;;  %v568_v63 = vpop.f32.mrf.mxu1 }
 0x169   :  { %692 = vst [vmem:[#allocation8 + $0xc8] sm:$0xff] %v373_v60  ;;  %724 = vst [vmem:[#allocation8 + $0x1c8] sm:$0xff] %v565_v61  ;;  %v377_v1 = vadd.f32 %v376_v62, %v1004_v39  ;;  %v569_v2 = vadd.f32 %v568_v63, %v1004_v39 }
 0x16a   :  { %v378_v3 = vpop.f32.mrf.mxu0  ;;  %v570_v4 = vpop.f32.mrf.mxu1 }
 0x16b   :  { %629 = vst [vmem:[#allocation7 + $0xd0] sm:$0xff] %v377_v1  ;;  %661 = vst [vmem:[#allocation7 + $0x1d0] sm:$0xff] %v569_v2  ;;  %v379_v5 = vadd.f32 %v378_v3, %v1006_v40  ;;  %v571_v6 = vadd.f32 %v570_v4, %v1006_v40 }
 0x16c   :  { %v382_v7 = vpop.f32.mrf.mxu0  ;;  %v574_v8 = vpop.f32.mrf.mxu1 }
 0x16d   :  { %693 = vst [vmem:[#allocation8 + $0xd0] sm:$0xff] %v379_v5  ;;  %725 = vst [vmem:[#allocation8 + $0x1d0] sm:$0xff] %v571_v6  ;;  %v383_v9 = vadd.f32 %v382_v7, %v1004_v39  ;;  %v575_v10 = vadd.f32 %v574_v8, %v1004_v39 }
 0x16e   :  { %v384_v11 = vpop.f32.mrf.mxu0  ;;  %v576_v12 = vpop.f32.mrf.mxu1 }
 0x16f   :  { %630 = vst [vmem:[#allocation7 + $0xd8] sm:$0xff] %v383_v9  ;;  %662 = vst [vmem:[#allocation7 + $0x1d8] sm:$0xff] %v575_v10  ;;  %v385_v13 = vadd.f32 %v384_v11, %v1006_v40  ;;  %v577_v14 = vadd.f32 %v576_v12, %v1006_v40 }
 0x170   :  { %v388_v15 = vpop.f32.mrf.mxu0  ;;  %v580_v16 = vpop.f32.mrf.mxu1 }
 0x171   :  { %694 = vst [vmem:[#allocation8 + $0xd8] sm:$0xff] %v385_v13  ;;  %726 = vst [vmem:[#allocation8 + $0x1d8] sm:$0xff] %v577_v14  ;;  %v389_v17 = vadd.f32 %v388_v15, %v1004_v39  ;;  %v581_v18 = vadd.f32 %v580_v16, %v1004_v39 }
 0x172   :  { %v390_v19 = vpop.f32.mrf.mxu0  ;;  %v582_v20 = vpop.f32.mrf.mxu1 }
 0x173   :  { %631 = vst [vmem:[#allocation7 + $0xe0] sm:$0xff] %v389_v17  ;;  %663 = vst [vmem:[#allocation7 + $0x1e0] sm:$0xff] %v581_v18  ;;  %v391_v21 = vadd.f32 %v390_v19, %v1006_v40  ;;  %v583_v22 = vadd.f32 %v582_v20, %v1006_v40 }
 0x174   :  { %v394_v23 = vpop.f32.mrf.mxu0  ;;  %v586_v24 = vpop.f32.mrf.mxu1 }
 0x175   :  { %695 = vst [vmem:[#allocation8 + $0xe0] sm:$0xff] %v391_v21  ;;  %727 = vst [vmem:[#allocation8 + $0x1e0] sm:$0xff] %v583_v22  ;;  %v395_v25 = vadd.f32 %v394_v23, %v1004_v39  ;;  %v587_v26 = vadd.f32 %v586_v24, %v1004_v39 }
 0x176   :  { %v396_v27 = vpop.f32.mrf.mxu0  ;;  %v588_v28 = vpop.f32.mrf.mxu1 }
 0x177   :  { %632 = vst [vmem:[#allocation7 + $0xe8] sm:$0xff] %v395_v25  ;;  %664 = vst [vmem:[#allocation7 + $0x1e8] sm:$0xff] %v587_v26  ;;  %v397_v29 = vadd.f32 %v396_v27, %v1006_v40  ;;  %v589_v30 = vadd.f32 %v588_v28, %v1006_v40 }
 0x178   :  { %v400_v31 = vpop.f32.mrf.mxu0  ;;  %v592_v32 = vpop.f32.mrf.mxu1 }
 0x179   :  { %696 = vst [vmem:[#allocation8 + $0xe8] sm:$0xff] %v397_v29  ;;  %728 = vst [vmem:[#allocation8 + $0x1e8] sm:$0xff] %v589_v30  ;;  %v401_v33 = vadd.f32 %v400_v31, %v1004_v39  ;;  %v593_v34 = vadd.f32 %v592_v32, %v1004_v39 }
 0x17a   :  { %v402_v35 = vpop.f32.mrf.mxu0  ;;  %v594_v36 = vpop.f32.mrf.mxu1 }
 0x17b   :  { %633 = vst [vmem:[#allocation7 + $0xf0] sm:$0xff] %v401_v33  ;;  %665 = vst [vmem:[#allocation7 + $0x1f0] sm:$0xff] %v593_v34  ;;  %v403_v37 = vadd.f32 %v402_v35, %v1006_v40  ;;  %v595_v38 = vadd.f32 %v594_v36, %v1006_v40 }
 0x17c   :  { %v406_v41 = vpop.f32.mrf.mxu0  ;;  %v598_v42 = vpop.f32.mrf.mxu1 }
 0x17d   :  { %697 = vst [vmem:[#allocation8 + $0xf0] sm:$0xff] %v403_v37  ;;  %729 = vst [vmem:[#allocation8 + $0x1f0] sm:$0xff] %v595_v38  ;;  %v407_v0 = vadd.f32 %v406_v41, %v1004_v39  ;;  %v599_v43 = vadd.f32 %v598_v42, %v1004_v39 }
 0x17e   :  { %v408_v44 = vpop.f32.mrf.mxu0  ;;  %v600_v45 = vpop.f32.mrf.mxu1 }
 0x17f   :  { %634 = vst [vmem:[#allocation7 + $0xf8] sm:$0xff] %v407_v0  ;;  %666 = vst [vmem:[#allocation7 + $0x1f8] sm:$0xff] %v599_v43  ;;  %v409_v46 = vadd.f32 %v408_v44, %v1006_v40  ;;  %v601_v47 = vadd.f32 %v600_v45, %v1006_v40 }
 0x180   :  { %857 = shalt.err (!%p854_p0)
}
 0x181   :  { %742 = dma.vmem_to_hbm [thread:$0]  %s737_s29, 8192, %s1151_s3, [#allocation4], %s895_s18, %s895_s18, %s896_s19   ;;  %698 = vst [vmem:[#allocation8 + $0xf8] sm:$0xff] %v409_v46  ;;  %730 = vst [vmem:[#allocation8 + $0x1f8] sm:$0xff] %v601_v47 }
 0x182   :  { %s866_s9 = scalar_lea.vmem %s749_s5, 8192  ;;  %p871_p2 = scmp.lt.s32.totalorder %s749_s5, %s749_s5 }
 0x183   :  { %p867_p1 = scmp.ne.s32.totalorder %s749_s5, %s866_s9  ;;  %p872_p3 = scmp.lt.s32.totalorder %s866_s9, %s866_s9 }
 0x185   :  { %p873_p4 = por %p872_p3, %p871_p2 }
 0x187   :  { %p874_p5 = pnand %p873_p4, %p867_p1 }
 0x189   :  { %877 = shalt.err (!%p874_p5)
}
 0x18a   :  { %754 = dma.vmem_to_hbm [thread:$0]  %s749_s5, 8192, %s1152_s4, [#allocation9], %s895_s18, %s895_s18, %s896_s19  }
 0x18b   :  { %890 = dma.done.wait [#allocation4], 8192  }
 0x18c   :  { %891 = vsyncadd [#allocation4], 4294959104 }
 0x18d   :  { %892 = dma.done.wait [#allocation9], 8192  }
 0x18e   :  { %893 = vsyncadd [#allocation9], 4294959104 }
 0x18f   :  { %761 = vsyncpa [#allocation3], 1 }
 0x190   :  { %762 = vsyncpa [#allocation6], 1 }
 0x191   :  { %763 = vsyncpa [#allocation4], 1 }
 0x192   :  { %764 = vsyncpa [#allocation9], 1 }

</bundles_post_ra>
